<compile_context>
chip_gen: v5e
topology: v5e:2x2
jax: 0.10.0
libtpu: 0.0.40
codegen_flags: <defaults>
</compile_context>

<pallas_src>
import functools

import jax
import jax.numpy as jnp
from jax.experimental import pallas as pl
from jax.experimental.pallas import tpu as pltpu


def _tv_kernel(x_ref, hmask_ref, wmask_ref, h_out_ref, w_out_ref,
               *, shift_h, shift_w):
    # x_ref: (nb, H*W) block of flattened images for this grid step.
    xf = x_ref[...].astype(jnp.float32)          # (nb, HW)
    hm = hmask_ref[...]                          # (1, HW) 1.0 where h-diff valid
    wm = wmask_ref[...]                          # (1, HW) 1.0 where w-diff valid

    # rolled[p] = x[(p + W) % HW]  -> next row, same column
    x_h = pltpu.roll(xf, shift=shift_h, axis=1) if shift_h else xf
    # rolled[p] = x[(p + 1) % HW]  -> same row, next column
    x_w = pltpu.roll(xf, shift=shift_w, axis=1) if shift_w else xf

    dh = x_h - xf
    dw = x_w - xf

    h_partial = jnp.sum(dh * dh * hm)
    w_partial = jnp.sum(dw * dw * wm)

    # One (8,128) tile per partial sum per grid step (disjoint blocks ->
    # safe under "parallel"); reduced to scalars in the wrapper.
    h_out_ref[...] = jnp.full(h_out_ref.shape, h_partial, jnp.float32)
    w_out_ref[...] = jnp.full(w_out_ref.shape, w_partial, jnp.float32)


def l_tv_loss(x, tv_loss_weight: float = 1.0, *, block_bytes: int = 4 * 1024 * 1024):
    """Total-variation loss matching the PyTorch L_TV module (NCHW input)."""
    B, C, H, W = x.shape
    HW = H * W
    N = B * C
    count_h = (H - 1) * W
    count_w = H * (W - 1)
    # NOTE: H==1 or W==1 divides by zero — identical behavior to the PyTorch
    # reference; not guarded here.

    itemsize = jnp.dtype(x.dtype).itemsize
    sub = 8 * max(1, 4 // itemsize)          # sublane multiple: f32->8, bf16->16, int8->32

    # Images per grid step: aim for ~block_bytes of input per block.
    nb = max(1, block_bytes // max(HW * itemsize, 1))
    nb = min(nb, N)
    nb = ((nb + sub - 1) // sub) * sub       # round up to sublane multiple
    G = -(-N // nb)                          # cdiv
    n_pad = G * nb

    x2 = x.reshape(N, HW)
    if n_pad != N:
        # Zero rows contribute 0 to both sums (all diffs are 0).
        x2 = jnp.pad(x2, ((0, n_pad - N), (0, 0)))

    # Positional masks over the flattened image (built once, tiny, resident).
    pos = jnp.arange(HW, dtype=jnp.int32)
    h_mask = (pos < (H - 1) * W).astype(jnp.float32).reshape(1, HW)
    w_mask = ((pos % W) != (W - 1)).astype(jnp.float32).reshape(1, HW)

    # np.roll convention: out[p] = x[(p - shift) % n]  =>  shift = n - k gives x[p + k].
    shift_h = (HW - W) % HW
    shift_w = (HW - 1) % HW

    kernel = functools.partial(_tv_kernel, shift_h=shift_h, shift_w=shift_w)

    h_parts, w_parts = pl.pallas_call(
        kernel,
        out_shape=(
            jax.ShapeDtypeStruct((G, 8, 128), jnp.float32),
            jax.ShapeDtypeStruct((G, 8, 128), jnp.float32),
        ),
        grid_spec=pltpu.PrefetchScalarGridSpec(
            num_scalar_prefetch=0,
            grid=(G,),
            in_specs=[
                pl.BlockSpec((nb, HW), lambda i: (i, 0)),
                pl.BlockSpec((1, HW), lambda i: (0, 0)),   # resident across steps
                pl.BlockSpec((1, HW), lambda i: (0, 0)),   # resident across steps
            ],
            out_specs=[
                pl.BlockSpec((1, 8, 128), lambda i: (i, 0, 0)),
                pl.BlockSpec((1, 8, 128), lambda i: (i, 0, 0)),
            ],
        ),
        compiler_params=pltpu.CompilerParams(
            dimension_semantics=("parallel",),
            vmem_limit_bytes=32 * 1024 * 1024,
        ),
    )(x2, h_mask, w_mask)

    h_tv = jnp.sum(h_parts[:, 0, 0])
    w_tv = jnp.sum(w_parts[:, 0, 0])
    return tv_loss_weight * 2.0 * (h_tv / count_h + w_tv / count_w) / B


def _reference(x, tv_loss_weight: float = 1.0):
    x = x.astype(jnp.float32)
    B, C, H, W = x.shape
    count_h = (H - 1) * W
    count_w = H * (W - 1)
    h_tv = jnp.sum((x[:, :, 1:, :] - x[:, :, :-1, :]) ** 2)
    w_tv = jnp.sum((x[:, :, :, 1:] - x[:, :, :, :-1]) ** 2)
    return tv_loss_weight * 2.0 * (h_tv / count_h + w_tv / count_w) / B


if __name__ == "__main__":
    key = jax.random.PRNGKey(0)
    x = jax.random.uniform(key, (2, 4, 16, 16), dtype=jnp.float32)

    out = jax.block_until_ready(l_tv_loss(x, tv_loss_weight=1.0))
    ref = _reference(x, tv_loss_weight=1.0)

    assert jnp.allclose(out, ref, rtol=1e-5, atol=1e-5), (out, ref)
    print("KERNEL_OK")
</pallas_src>

<mosaic_0001>
module attributes {stable_mosaic.version = 11 : i64} {
  func.func @_tv_kernel(%arg0: i32, %arg1: memref<8x256xf32, #tpu.memory_space<vmem>>, %arg2: memref<1x256xf32, #tpu.memory_space<vmem>>, %arg3: memref<1x256xf32, #tpu.memory_space<vmem>>, %arg4: memref<1x8x128xf32, #tpu.memory_space<vmem>>, %arg5: memref<1x8x128xf32, #tpu.memory_space<vmem>>) attributes {dimension_semantics = [#tpu.dimension_semantics<parallel>], iteration_bounds = array<i64: 1>, scalar_prefetch = 0 : i64, scratch_operands = 0 : i64, tpu.core_type = #tpu.core_type<tc>, window_params = [{transform_indices = @transform_0, window_bounds = array<i64: 8, 256>}, {pipeline_mode = #tpu.pipeline_mode<synchronous>, transform_indices = @transform_1, window_bounds = array<i64: 1, 256>}, {pipeline_mode = #tpu.pipeline_mode<synchronous>, transform_indices = @transform_2, window_bounds = array<i64: 1, 256>}, {transform_indices = @transform_3, window_bounds = array<i64: 1, 8, 128>}, {transform_indices = @transform_4, window_bounds = array<i64: 1, 8, 128>}]} {
    %c0 = arith.constant 0 : index
    %c0_0 = arith.constant 0 : index
    %0 = vector.load %arg1[%c0, %c0_0] : memref<8x256xf32, #tpu.memory_space<vmem>>, vector<8x256xf32>
    %c0_1 = arith.constant 0 : index
    %c0_2 = arith.constant 0 : index
    %1 = vector.load %arg2[%c0_1, %c0_2] : memref<1x256xf32, #tpu.memory_space<vmem>>, vector<1x256xf32>
    %c0_3 = arith.constant 0 : index
    %c0_4 = arith.constant 0 : index
    %2 = vector.load %arg3[%c0_3, %c0_4] : memref<1x256xf32, #tpu.memory_space<vmem>>, vector<1x256xf32>
    %c240_i32 = arith.constant 240 : i32
    %3 = tpu.dynamic_rotate %0 by %c240_i32 dim 1 : vector<8x256xf32>, i32 -> vector<8x256xf32>
    %c255_i32 = arith.constant 255 : i32
    %4 = tpu.dynamic_rotate %0 by %c255_i32 dim 1 : vector<8x256xf32>, i32 -> vector<8x256xf32>
    %5 = arith.subf %3, %0 : vector<8x256xf32>
    %6 = arith.subf %4, %0 : vector<8x256xf32>
    %7 = arith.mulf %5, %5 : vector<8x256xf32>
    %8 = vector.broadcast %1 : vector<1x256xf32> to vector<8x256xf32>
    %9 = arith.mulf %7, %8 : vector<8x256xf32>
    %10 = vector.shape_cast %9 : vector<8x256xf32> to vector<1x8x256xf32>
    %cst = arith.constant dense<0.000000e+00> : vector<1xf32>
    %11 = vector.multi_reduction <add>, %10, %cst [1, 2] : vector<1x8x256xf32> to vector<1xf32>
    %12 = vector.shape_cast %11 : vector<1xf32> to vector<1x1x1xf32>
    %13 = vector.extract %12[0, 0, 0] : f32 from vector<1x1x1xf32>
    %14 = arith.mulf %6, %6 : vector<8x256xf32>
    %15 = vector.broadcast %2 : vector<1x256xf32> to vector<8x256xf32>
    %16 = arith.mulf %14, %15 : vector<8x256xf32>
    %17 = vector.shape_cast %16 : vector<8x256xf32> to vector<1x8x256xf32>
    %cst_5 = arith.constant dense<0.000000e+00> : vector<1xf32>
    %18 = vector.multi_reduction <add>, %17, %cst_5 [1, 2] : vector<1x8x256xf32> to vector<1xf32>
    %19 = vector.shape_cast %18 : vector<1xf32> to vector<1x1x1xf32>
    %20 = vector.extract %19[0, 0, 0] : f32 from vector<1x1x1xf32>
    %21 = vector.broadcast %13 : f32 to vector<1x8x128xf32>
    %c0_6 = arith.constant 0 : index
    %c0_7 = arith.constant 0 : index
    %c0_8 = arith.constant 0 : index
    %22 = vector.load %arg4[%c0_6, %c0_7, %c0_8] : memref<1x8x128xf32, #tpu.memory_space<vmem>>, vector<1x8x128xf32>
    tpu.vector_store %arg4[%c0_6, %c0_7, %c0_8], %21 {strides = array<i32>} : memref<1x8x128xf32, #tpu.memory_space<vmem>>, vector<1x8x128xf32>,
    %23 = vector.broadcast %20 : f32 to vector<1x8x128xf32>
    %c0_9 = arith.constant 0 : index
    %c0_10 = arith.constant 0 : index
    %c0_11 = arith.constant 0 : index
    %24 = vector.load %arg5[%c0_9, %c0_10, %c0_11] : memref<1x8x128xf32, #tpu.memory_space<vmem>>, vector<1x8x128xf32>
    tpu.vector_store %arg5[%c0_9, %c0_10, %c0_11], %23 {strides = array<i32>} : memref<1x8x128xf32, #tpu.memory_space<vmem>>, vector<1x8x128xf32>,
    return
  }
  func.func @transform_0(%arg0: i32) -> (i32, i32) {
    %c0_i32 = arith.constant 0 : i32
    %c0_i32_0 = arith.constant 0 : i32
    return %arg0, %c0_i32 : i32, i32
  }
  func.func @transform_1(%arg0: i32) -> (i32, i32) {
    %c0_i32 = arith.constant 0 : i32
    %c0_i32_0 = arith.constant 0 : i32
    %c0_i32_1 = arith.constant 0 : i32
    return %c0_i32, %c0_i32_0 : i32, i32
  }
  func.func @transform_2(%arg0: i32) -> (i32, i32) {
    %c0_i32 = arith.constant 0 : i32
    %c0_i32_0 = arith.constant 0 : i32
    %c0_i32_1 = arith.constant 0 : i32
    return %c0_i32, %c0_i32_0 : i32, i32
  }
  func.func @transform_3(%arg0: i32) -> (i32, i32, i32) {
    %c0_i32 = arith.constant 0 : i32
    %c0_i32_0 = arith.constant 0 : i32
    %c0_i32_1 = arith.constant 0 : i32
    return %arg0, %c0_i32, %c0_i32_0 : i32, i32, i32
  }
  func.func @transform_4(%arg0: i32) -> (i32, i32, i32) {
    %c0_i32 = arith.constant 0 : i32
    %c0_i32_0 = arith.constant 0 : i32
    %c0_i32_1 = arith.constant 0 : i32
    return %arg0, %c0_i32, %c0_i32_0 : i32, i32, i32
  }
}

</mosaic_0001>

<bundles_post_ra>
// kernel: tpu_custom_call.1
= control target key start
LH: loop header
LB: loop body
LE: loop exit
PB: predicated region body
PF: predicated region fallthrough
CT: control target
= control target key end

     0   :  { %10 = vsyncpa [#allocation3], 0  ;;  %s345_s0 = inlined_call_operand.hbm [shape: f32[8,256], index: 0, kind: input, shape index: {}]   ;;  %s346_s1 = inlined_call_operand.hbm [shape: f32[1,256], index: 1, kind: input, shape index: {}]   ;;  %s347_s2 = inlined_call_operand.hbm [shape: f32[1,256], index: 2, kind: input, shape index: {}]   ;;  %s348_s3 = inlined_call_operand.hbm [shape: f32[1,8,128], index: 3, kind: output, shape index: {0}]   ;;  %s349_s4 = inlined_call_operand.hbm [shape: f32[1,8,128], index: 4, kind: output, shape index: {1}]  }
   0x1   :  { %11 = vsyncpa [#allocation6], 0 }
   0x2   :  { %12 = vsyncpa [#allocation4], 0  ;;  %s30_s17 = sshll.u32 %s346_s1, 4  ;;  %s31_s17 = int_to_ptr.hbm [resolvable:$true] %s30_s17 }
   0x3   :  { %13 = vsyncpa [#allocation10], 0  ;;  %s298_s18 = smov [#allocation5]   ;;  %s19_s22 = sshll.u32 %s345_s0, 4  ;;  %s20_s22 = int_to_ptr.hbm [resolvable:$true] %s19_s22 }
   0x4   :  { %s32_s19 = sshll.u32 %s298_s18, 4  ;;  %s299_s23 = smov [#allocation2]   ;;  %s33_s19 = int_to_ptr.vmem [resolvable:$true] %s32_s19 }
   0x5   :  { %35 = dma.hbm_to_vmem [thread:$0]  %s31_s17, 32, %s33_s19, [#allocation6]  }
   0x6   :  { %s21_s24 = sshll.u32 %s299_s23, 4  ;;  %s41_s27 = sshll.u32 %s347_s2, 4  ;;  %s22_s24 = int_to_ptr.vmem [resolvable:$true] %s21_s24  ;;  %s42_s27 = int_to_ptr.hbm [resolvable:$true] %s41_s27 }
   0x7   :  { %24 = dma.hbm_to_vmem [thread:$0]  %s20_s22, 256, %s22_s24, [#allocation3]  }
   0x8   :  { %s300_s1 = smov [#allocation7]  }
   0x9   :  { %s43_s28 = sshll.u32 %s300_s1, 4  ;;  %s44_s28 = int_to_ptr.vmem [resolvable:$true] %s43_s28 }
   0xa   :  { %46 = dma.hbm_to_vmem [thread:$0]  %s42_s27, 32, %s44_s28, [#allocation6]  }
   0xb   :  { %290 = dma.done.wait [#allocation3], 256  }
   0xc   :  { %291 = vsyncadd [#allocation3], 4294967040 }
   0xd   :  { %292 = dma.done.wait [#allocation6], 64  }
   0xe   :  { %293 = vsyncadd [#allocation6], 4294967232  ;;  %v59_v0 = vld [vmem:[#allocation2] sm:$0xff]  ;;  %s301_s0 = smov 127   ;;  %s302_s29 = smov 112   ;;  %v60_v1 = vld [vmem:[#allocation2 + $0x8] sm:$0xff]  ;;  %v67_v2 = vlaneseq }
   0xf   :  { %72 = vrot.lane.b32.xlu1 %v59_v0, %s301_s0  ;;  %63 = vrot.lane.b32.xlu0 %v59_v0, %s302_s29  ;;  %v61_v6 = vld [vmem:[#allocation5] sm:$0x3]  ;;  %v62_v21 = vld [vmem:[#allocation7] sm:$0x3]  ;;  %s303_s2 = smov [#allocation8]   ;;  %s132_s7 = sshll.u32 %s348_s3, 4  ;;  %s133_s7 = int_to_ptr.hbm [resolvable:$true] %s132_s7 }
  0x10   :  { %v68_v5 = vand.u32 127, %v67_v2  ;;  %v86_v15 = vperm.slane %v61_v6, 0  ;;  %v87_v16 = vperm.slane %v61_v6, 1  ;;  %v105_v24 = vperm.slane %v62_v21, 0  ;;  %s130_s30 = sshll.u32 %s303_s2, 4  ;;  %s304_s9 = smov [#allocation9]   ;;  %s131_s30 = int_to_ptr.vmem [resolvable:$true] %s130_s30 }
  0x11   :  { %v106_v28 = vperm.slane %v62_v21, 1  ;;  %s141_s10 = sshll.u32 %s304_s9, 4  ;;  %s143_s13 = sshll.u32 %s349_s4, 4  ;;  %s142_s10 = int_to_ptr.vmem [resolvable:$true] %s141_s10  ;;  %s144_s13 = int_to_ptr.hbm [resolvable:$true] %s143_s13 }
  0x12   :  { %vm76_vm0 = vcmp.lt.s32.totalorder %v68_v5, 127  ;;  %vm69_vm1 = vcmp.lt.s32.totalorder %v68_v5, 112 }
  0x17   :  { %74 = vrot.lane.b32.xlu1 %v60_v1, %s301_s0  ;;  %65 = vrot.lane.b32.xlu0 %v60_v1, %s302_s29 }
  0x81   :  { %v73_v3 = vpop.permute.xlu1 %72  ;;  %v64_v4 = vpop.permute.xlu0 %63 }
  0x89   :  { %v75_v7 = vpop.permute.xlu1 %74  ;;  %v66_v8 = vpop.permute.xlu0 %65 }
  0x8a   :  { %v77_v9 = vsel %vm76_vm0, %v73_v3, %v75_v7  ;;  %v78_v10 = vsel %vm76_vm0, %v75_v7, %v73_v3  ;;  %v70_v11 = vsel %vm69_vm1, %v64_v4, %v66_v8  ;;  %v71_v12 = vsel %vm69_vm1, %v66_v8, %v64_v4 }
  0x8b   :  { %v79_v13 = vsub.f32 %v70_v11, %v59_v0  ;;  %v80_v14 = vsub.f32 %v71_v12, %v60_v1  ;;  %v81_v17 = vsub.f32 %v77_v9, %v59_v0  ;;  %v82_v18 = vsub.f32 %v78_v10, %v60_v1 }
  0x8d   :  { %v83_v19 = vmul.f32 %v79_v13, %v79_v13  ;;  %v84_v20 = vmul.f32 %v80_v14, %v80_v14  ;;  %v102_v25 = vmul.f32 %v81_v17, %v81_v17  ;;  %v103_v26 = vmul.f32 %v82_v18, %v82_v18 }
  0x8f   :  { %v90_v22 = vmul.f32 %v86_v15, %v83_v19  ;;  %v91_v23 = vmul.f32 %v87_v16, %v84_v20  ;;  %v109_v29 = vmul.f32 %v105_v24, %v102_v25  ;;  %v110_v30 = vmul.f32 %v106_v28, %v103_v26 }
  0x91   :  { %v92_v27 = vadd.f32 %v91_v23, %v90_v22  ;;  %v111_v31 = vadd.f32 %v110_v30, %v109_v29 }
  0x93   :  { %93 = vadd.xlane.f32.xlu2 %v92_v27 }
  0x9b   :  { %112 = vadd.xlane.f32.xlu2 %v111_v31 }
 0x106   :  { %v94_v32 = vpop.xlane.xlu2 %93 }
 0x107   :  { %v95_v33 = vrot.slane %v94_v32, 4 }
 0x109   :  { %v96_v34 = vadd.f32 %v95_v33, %v94_v32 }
 0x10b   :  { %v97_v35 = vrot.slane %v96_v34, 2 }
 0x10d   :  { %v98_v36 = vadd.f32 %v97_v35, %v96_v34 }
 0x10e   :  { %v113_v37 = vpop.xlane.xlu2 %112 }
 0x10f   :  { %v114_v38 = vrot.slane %v113_v37, 4  ;;  %v99_v39 = vrot.slane %v98_v36, 1 }
 0x111   :  { %v115_v40 = vadd.f32 %v114_v38, %v113_v37  ;;  %v100_v41 = vadd.f32 %v99_v39, %v98_v36 }
 0x113   :  { %v116_v42 = vrot.slane %v115_v40, 2  ;;  %159 = vpush %v100_v41 }
 0x115   :  { %v117_v43 = vadd.f32 %v116_v42, %v115_v40 }
 0x117   :  { %v118_v44 = vrot.slane %v117_v43, 1 }
 0x119   :  { %v119_v45 = vadd.f32 %v118_v44, %v117_v43 }
 0x11b   :  { %161 = vpush %v119_v45 }
 0x144   :  { %s160_s8 = spop %159 }
 0x145   :  { %v121_v46 = vstv %s160_s8 }
 0x146   :  { %122 = vst [vmem:[#allocation8] sm:$0xff] %v121_v46 }
 0x147   :  { %135 = dma.vmem_to_hbm [thread:$0]  %s131_s30, 128, %s133_s7, [#allocation4]  }
 0x14c   :  { %s162_s14 = spop %161 }
 0x14d   :  { %v123_v47 = vstv %s162_s14 }
 0x14e   :  { %124 = vst [vmem:[#allocation9] sm:$0xff] %v123_v47 }
 0x14f   :  { %146 = dma.vmem_to_hbm [thread:$0]  %s142_s10, 128, %s144_s13, [#allocation10]  }
 0x150   :  { %294 = dma.done.wait [#allocation4], 128  }
 0x151   :  { %295 = vsyncadd [#allocation4], 4294967168 }
 0x152   :  { %296 = dma.done.wait [#allocation10], 128  }
 0x153   :  { %297 = vsyncadd [#allocation10], 4294967168 }
 0x154   :  { %155 = vsyncpa [#allocation3], 1 }
 0x155   :  { %156 = vsyncpa [#allocation6], 1 }
 0x156   :  { %157 = vsyncpa [#allocation4], 1 }
 0x157   :  { %158 = vsyncpa [#allocation10], 1 }

</bundles_post_ra>
